<compile_context>
chip_gen: v7x
topology: tpu7x:2x2x1
jax: 0.10.0
libtpu: 0.0.40
codegen_flags: <defaults>
</compile_context>

<pallas_src>
import jax
import jax.numpy as jnp
from jax.experimental import pallas as pl
from jax.experimental.pallas import tpu as pltpu

_LN_EPS = 1e-5
_SQRT_2_OVER_PI = 0.7978845608028654


# --------------------------------------------------------------------------
# generation-aware budgets
# --------------------------------------------------------------------------
_VMEM_LIMIT_CACHE = None


def _vmem_limit():
    """~80% of physical VMEM (capped), so the compiler keeps headroom."""
    global _VMEM_LIMIT_CACHE
    if _VMEM_LIMIT_CACHE is None:
        cap = 64 * 1024 * 1024
        try:
            c = int(pltpu.get_tpu_info().vmem_capacity_bytes)
            if c >= 16 * 1024 * 1024:
                cap = c
        except Exception:
            pass
        _VMEM_LIMIT_CACHE = min(int(cap * 0.8), 112 * 1024 * 1024)
    return _VMEM_LIMIT_CACHE


def _matmul_targets():
    """(tm_cap, tn_target, tk_target): larger tiles on 128-MiB chips."""
    if _vmem_limit() >= 96 * 1024 * 1024:       # v5e / v6e
        return 512, 1024, 512
    return 256, 512, 512                        # v7x (64 MiB per TC)


def _round_up(x, m):
    return ((x + m - 1) // m) * m


def _pick_tm(rows, cap):
    """Row tile: full rows (8-aligned) when small, else minimize pad waste."""
    if rows <= cap:
        return _round_up(rows, 8)
    best_t, best_w = None, None
    for t in (cap, max(cap // 2, 8), 128):
        w = _round_up(rows, t) - rows
        if best_w is None or w < best_w:
            best_t, best_w = t, w
    return best_t


def _dividing_tile(full, target, align):
    """Largest multiple of `align` dividing `full`, <= target; else full dim."""
    if full <= target or full % align != 0:
        return full
    t = (target // align) * align
    while full % t != 0:
        t -= align
    return t


def _gelu_tanh(x):
    # 0.5 * x * (1 + tanh(sqrt(2/pi) * (x + 0.044715 x^3)))   (EUP tanh)
    return 0.5 * x * (1.0 + jnp.tanh(_SQRT_2_OVER_PI * (x + 0.044715 * x * x * x)))


# --------------------------------------------------------------------------
# Generic linear kernel: y = act(LN?(x) @ W + b) (+ residual), fused epilogue
# --------------------------------------------------------------------------
def _make_linear_kernel(fuse_ln, activation, add_residual):
    def kernel(*refs):
        idx = 0
        x_ref = refs[idx]; idx += 1
        if fuse_ln:
            ln_scale_ref = refs[idx]; idx += 1
            ln_shift_ref = refs[idx]; idx += 1
        w_ref = refs[idx]; idx += 1
        b_ref = refs[idx]; idx += 1
        if add_residual:
            res_ref = refs[idx]; idx += 1
        o_ref = refs[idx]; idx += 1
        acc_ref = refs[idx]

        k = pl.program_id(2)

        @pl.when(k == 0)
        def _():
            acc_ref[...] = jnp.zeros_like(acc_ref)

        if fuse_ln:
            # LayerNorm (unbiased variance, matches the PyTorch module) on the
            # full-K row tile, in f32, then cast to bf16 for the MXU.
            xf = x_ref[...].astype(jnp.float32)
            d = xf.shape[-1]
            mean = jnp.mean(xf, axis=-1, keepdims=True)
            cen = xf - mean
            var = jnp.sum(cen * cen, axis=-1, keepdims=True) * (1.0 / (d - 1))
            inv = jax.lax.rsqrt(var + jnp.float32(_LN_EPS))
            xf = (cen * inv) * ln_scale_ref[...].astype(jnp.float32) \
                 + ln_shift_ref[...].astype(jnp.float32)
            x_in = xf.astype(jnp.bfloat16)
        else:
            x_in = x_ref[...].astype(jnp.bfloat16)

        acc_ref[...] += jnp.dot(x_in, w_ref[...].astype(jnp.bfloat16),
                                preferred_element_type=jnp.float32)

        @pl.when(k == pl.num_programs(2) - 1)
        def _():
            y = acc_ref[...] + b_ref[...].astype(jnp.float32)
            if activation == "gelu":
                y = _gelu_tanh(y)
            if add_residual:
                y = y + res_ref[...].astype(jnp.float32)
            o_ref[...] = y.astype(o_ref.dtype)

    return kernel


def linear(x2, w, b, *, activation=None, residual=None, ln=None):
    """x2: (rows, K), w: (K, N) [bf16 ok], b: (N,), optional residual (rows, N),
    optional ln=(scale, shift) fused before the matmul (forces tk = K)."""
    rows, K = x2.shape
    N = w.shape[1]

    tm_cap, tn_target, tk_target = _matmul_targets()
    tm = _pick_tm(rows, tm_cap)
    padded = _round_up(rows, tm)
    if padded != rows:
        xp = jnp.pad(x2, ((0, padded - rows), (0, 0)))
        resp = (jnp.pad(residual, ((0, padded - rows), (0, 0)))
                if residual is not None else None)
    else:
        xp, resp = x2, residual

    n_align = 256 if N % 256 == 0 else 128
    k_align = 256 if K % 256 == 0 else 128
    tn = _dividing_tile(N, tn_target, n_align)
    tk = K if ln is not None else _dividing_tile(K, tk_target, k_align)
    grid = (padded // tm, N // tn, K // tk)

    in_specs = [pl.BlockSpec((tm, tk), lambda i, j, k: (i, k))]
    args = [xp]
    if ln is not None:
        scale, shift = ln
        in_specs += [pl.BlockSpec((1, K), lambda i, j, k: (0, 0)),
                     pl.BlockSpec((1, K), lambda i, j, k: (0, 0))]
        args += [scale.reshape(1, K).astype(jnp.float32),
                 shift.reshape(1, K).astype(jnp.float32)]
    in_specs += [pl.BlockSpec((tk, tn), lambda i, j, k: (k, j)),
                 pl.BlockSpec((1, tn), lambda i, j, k: (0, j))]
    args += [w, b.reshape(1, N)]
    if residual is not None:
        in_specs.append(pl.BlockSpec((tm, tn), lambda i, j, k: (i, j)))
        args.append(resp)

    out = pl.pallas_call(
        _make_linear_kernel(ln is not None, activation, residual is not None),
        out_shape=jax.ShapeDtypeStruct((padded, N), x2.dtype),
        grid_spec=pltpu.PrefetchScalarGridSpec(
            num_scalar_prefetch=0,
            grid=grid,
            in_specs=in_specs,
            out_specs=pl.BlockSpec((tm, tn), lambda i, j, k: (i, j)),
            scratch_shapes=[pltpu.VMEM((tm, tn), jnp.float32)],
        ),
        compiler_params=pltpu.CompilerParams(
            dimension_semantics=("parallel", "parallel", "arbitrary"),
            vmem_limit_bytes=_vmem_limit(),
        ),
    )(*args)

    return out[:rows] if padded != rows else out


# --------------------------------------------------------------------------
# Flash-style causal attention over head-packed (B, S, D) slabs
#   grid = (B, q blocks, kv blocks); kv is the reduction axis (last).
#   All heads handled per grid step -> lane-dense (tq, D) output blocks,
#   no head transposes in HBM.
# --------------------------------------------------------------------------
def _make_attn_kernel(n_heads, hd, scale, tq, tkv):
    def kernel(q_ref, k_ref, v_ref, o_ref, m_sc, l_sc, acc_sc):
        j = pl.program_id(2)
        q_start = pl.program_id(1) * tq
        kv_start = j * tkv

        @pl.when(j == 0)
        def _():
            m_sc[...] = jnp.full_like(m_sc, -jnp.inf)
            l_sc[...] = jnp.zeros_like(l_sc)
            acc_sc[...] = jnp.zeros_like(acc_sc)

        def update(apply_mask):
            # 1/sqrt(hd) folded into Q (cheaper than scaling (tq, tkv) scores).
            q = q_ref[0].astype(jnp.float32) * jnp.float32(scale)   # (tq, D)
            k = k_ref[0]                                            # (tkv, D)
            v = v_ref[0]
            if apply_mask:
                row = q_start + jax.lax.broadcasted_iota(jnp.int32, (tq, tkv), 0)
                col = kv_start + jax.lax.broadcasted_iota(jnp.int32, (tq, tkv), 1)
                above = col > row
            for h in range(n_heads):
                sl = slice(h * hd, (h + 1) * hd)
                qh = q[:, sl].astype(jnp.bfloat16)
                kh = k[:, sl].astype(jnp.bfloat16)
                vh = v[:, sl].astype(jnp.bfloat16)
                s = jax.lax.dot_general(qh, kh, (((1,), (1,)), ((), ())),
                                        preferred_element_type=jnp.float32)
                if apply_mask:
                    s = jnp.where(above, jnp.float32(-1e30), s)
                m_prev = m_sc[h]                                    # (tq, 1)
                m_new = jnp.maximum(m_prev, jnp.max(s, axis=-1, keepdims=True))
                alpha = jnp.exp(m_prev - m_new)
                p = jnp.exp(s - m_new)
                l_sc[h] = alpha * l_sc[h] + jnp.sum(p, axis=-1, keepdims=True)
                acc_sc[h] = alpha * acc_sc[h] + jnp.dot(
                    p.astype(jnp.bfloat16), vh, preferred_element_type=jnp.float32)
                m_sc[h] = m_new

        in_range = kv_start <= q_start + (tq - 1)        # not fully above diag
        needs_mask = (kv_start + tkv - 1) > q_start      # straddles the diagonal

        @pl.when(in_range & needs_mask)
        def _():
            update(True)

        @pl.when(in_range & jnp.logical_not(needs_mask))
        def _():
            update(False)

        @pl.when(j == pl.num_programs(2) - 1)
        def _():
            parts = []
            for h in range(n_heads):
                inv = pl.reciprocal(l_sc[h], approx=True)
                parts.append(acc_sc[h] * inv)
            o_ref[0] = jnp.concatenate(parts, axis=-1).astype(o_ref.dtype)

    return kernel


def _attn_tiles(S):
    Sp = _round_up(S, 8)
    if Sp <= 128:
        return Sp, Sp, Sp
    t = 128
    Sp = _round_up(S, t)
    return Sp, t, t


def causal_attention(q, k, v, *, n_heads):
    """q, k, v: (B, S, D) head-packed -> (B, S, D)."""
    B, S, D = q.shape
    hd = D // n_heads
    scale = 1.0 / (hd ** 0.5)
    Sp, tq, tkv = _attn_tiles(S)
    if Sp != S:
        pad = ((0, 0), (0, Sp - S), (0, 0))
        q, k, v = jnp.pad(q, pad), jnp.pad(k, pad), jnp.pad(v, pad)

    q_spec = pl.BlockSpec((1, tq, D), lambda b, i, j: (b, i, 0))
    kv_spec = pl.BlockSpec((1, tkv, D), lambda b, i, j: (b, j, 0))

    out = pl.pallas_call(
        _make_attn_kernel(n_heads, hd, scale, tq, tkv),
        out_shape=jax.ShapeDtypeStruct((B, Sp, D), q.dtype),
        grid_spec=pltpu.PrefetchScalarGridSpec(
            num_scalar_prefetch=0,
            grid=(B, Sp // tq, Sp // tkv),
            in_specs=[q_spec, kv_spec, kv_spec],
            out_specs=pl.BlockSpec((1, tq, D), lambda b, i, j: (b, i, 0)),
            scratch_shapes=[pltpu.VMEM((n_heads, tq, 1), jnp.float32),
                            pltpu.VMEM((n_heads, tq, 1), jnp.float32),
                            pltpu.VMEM((n_heads, tq, hd), jnp.float32)],
        ),
        compiler_params=pltpu.CompilerParams(
            dimension_semantics=("parallel", "parallel", "arbitrary"),
            vmem_limit_bytes=_vmem_limit(),
        ),
    )(q, k, v)

    return out[:, :S] if Sp != S else out


# --------------------------------------------------------------------------
# Full TransformerBlock forward
# --------------------------------------------------------------------------
def transformer_block(x, params, *, n_heads):
    B, S, D = x.shape
    x2 = x.reshape(B * S, D)

    # MXU wants bf16 operands; cast weights once here (biases/LN stay f32).
    w_qkv = params["w_qkv"].astype(jnp.bfloat16)
    w_o = params["w_o"].astype(jnp.bfloat16)
    w_ff1 = params["w_ff1"].astype(jnp.bfloat16)
    w_ff2 = params["w_ff2"].astype(jnp.bfloat16)

    # ---- attention sub-block: x = out_proj(MHA(LN1(x))) + x ----
    qkv = linear(x2, w_qkv, params["b_qkv"],
                 ln=(params["ln1_scale"], params["ln1_shift"]))      # (B*S, 3D)
    qkv3 = qkv.reshape(B, S, 3, D)                                   # free reshape
    q, k, v = qkv3[:, :, 0], qkv3[:, :, 1], qkv3[:, :, 2]            # head-packed
    ctx = causal_attention(q, k, v, n_heads=n_heads)                 # (B, S, D)
    x2 = linear(ctx.reshape(B * S, D), w_o, params["b_o"],
                residual=x2)                                         # fused +skip

    # ---- FFN sub-block: x = W2(GELU(W1(LN2(x)))) + x ----
    ff = linear(x2, w_ff1, params["b_ff1"], activation="gelu",
                ln=(params["ln2_scale"], params["ln2_shift"]))
    x2 = linear(ff, w_ff2, params["b_ff2"], residual=x2)             # fused +skip

    return x2.reshape(B, S, D)


# --------------------------------------------------------------------------
# Pure-JAX reference (mirrors the PyTorch module semantics, f32)
# --------------------------------------------------------------------------
def _reference_block(x, params, n_heads):
    def ln(t, scale, shift):
        mean = jnp.mean(t, axis=-1, keepdims=True)
        var = jnp.sum((t - mean) ** 2, axis=-1, keepdims=True) / (t.shape[-1] - 1)
        return scale * ((t - mean) / jnp.sqrt(var + _LN_EPS)) + shift

    def gelu(t):
        return 0.5 * t * (1 + jnp.tanh(jnp.sqrt(2.0 / jnp.pi)
                                       * (t + 0.044715 * t ** 3)))

    B, S, D = x.shape
    hd = D // n_heads
    skip = x
    h = ln(x, params["ln1_scale"], params["ln1_shift"])
    qkv = h @ params["w_qkv"] + params["b_qkv"]
    q, k, v = jnp.split(qkv, 3, axis=-1)
    heads = lambda t: t.reshape(B, S, n_heads, hd).transpose(0, 2, 1, 3)
    q, k, v = heads(q), heads(k), heads(v)
    scores = jnp.einsum("bhqd,bhkd->bhqk", q, k)
    mask = jnp.triu(jnp.ones((S, S), dtype=bool), k=1)
    scores = jnp.where(mask, -jnp.inf, scores)
    attn = jax.nn.softmax(scores / jnp.sqrt(jnp.float32(hd)), axis=-1)
    ctx = jnp.einsum("bhqk,bhkd->bhqd", attn, v).transpose(0, 2, 1, 3).reshape(B, S, D)
    x1 = ctx @ params["w_o"] + params["b_o"] + skip
    h2 = ln(x1, params["ln2_scale"], params["ln2_shift"])
    ff = gelu(h2 @ params["w_ff1"] + params["b_ff1"])
    return ff @ params["w_ff2"] + params["b_ff2"] + x1


# --------------------------------------------------------------------------
if __name__ == "__main__":
    B, S, D, H = 2, 8, 32, 4          # emb_dim=32, context_length=8, n_heads=4
    key = jax.random.PRNGKey(0)
    ks = jax.random.split(key, 10)

    def init(k, shape, scale=0.1):
        return jax.random.normal(k, shape, dtype=jnp.float32) * scale

    x = jax.random.normal(ks[0], (B, S, D), dtype=jnp.float32)

    w_q, w_k, w_v = init(ks[1], (D, D)), init(ks[2], (D, D)), init(ks[3], (D, D))
    params = {
        "ln1_scale": jnp.ones((D,), jnp.float32),
        "ln1_shift": jnp.zeros((D,), jnp.float32),
        "ln2_scale": jnp.ones((D,), jnp.float32),
        "ln2_shift": jnp.zeros((D,), jnp.float32),
        "w_qkv": jnp.concatenate([w_q, w_k, w_v], axis=1),   # (D, 3D)
        "b_qkv": jnp.zeros((3 * D,), jnp.float32),           # qkv_bias=False
        "w_o": init(ks[4], (D, D)),
        "b_o": init(ks[5], (D,)),
        "w_ff1": init(ks[6], (D, 4 * D)),
        "b_ff1": init(ks[7], (4 * D,)),
        "w_ff2": init(ks[8], (4 * D, D)),
        "b_ff2": init(ks[9], (D,)),
    }

    out = transformer_block(x, params, n_heads=H)
    out = jax.block_until_ready(out)

    ref = _reference_block(x, params, H)

    assert out.shape == x.shape and out.dtype == x.dtype
    # Tolerance covers bf16 MXU inputs (f32 accumulation).
    assert jnp.allclose(out, ref, atol=3e-2, rtol=3e-2), \
        f"max abs diff {jnp.max(jnp.abs(out - ref))}"
    print("KERNEL_OK")
</pallas_src>

<mosaic_0001>
module attributes {stable_mosaic.version = 11 : i64} {
  func.func @kernel(%arg0: i32, %arg1: i32, %arg2: i32, %arg3: memref<16x32xf32, #tpu.memory_space<vmem>>, %arg4: memref<1x32xf32, #tpu.memory_space<vmem>>, %arg5: memref<1x32xf32, #tpu.memory_space<vmem>>, %arg6: memref<32x96xbf16, #tpu.memory_space<vmem>>, %arg7: memref<1x96xf32, #tpu.memory_space<vmem>>, %arg8: memref<16x96xf32, #tpu.memory_space<vmem>>, %arg9: memref<16x96xf32, #tpu.memory_space<vmem>>) attributes {dimension_semantics = [#tpu.dimension_semantics<parallel>, #tpu.dimension_semantics<parallel>, #tpu.dimension_semantics<arbitrary>], iteration_bounds = array<i64: 1, 1, 1>, scalar_prefetch = 0 : i64, scratch_operands = 1 : i64, tpu.core_type = #tpu.core_type<tc>, window_params = [{transform_indices = @transform_0, window_bounds = array<i64: 16, 32>}, {pipeline_mode = #tpu.pipeline_mode<synchronous>, transform_indices = @transform_1, window_bounds = array<i64: 1, 32>}, {pipeline_mode = #tpu.pipeline_mode<synchronous>, transform_indices = @transform_2, window_bounds = array<i64: 1, 32>}, {transform_indices = @transform_3, window_bounds = array<i64: 32, 96>}, {transform_indices = @transform_4, window_bounds = array<i64: 1, 96>}, {transform_indices = @transform_5, window_bounds = array<i64: 16, 96>}]} {
    %c0_i32 = arith.constant 0 : i32
    %0 = arith.cmpi eq, %arg2, %c0_i32 : i32
    %1 = arith.extui %0 : i1 to i32
    %c0_i32_0 = arith.constant 0 : i32
    %2 = arith.cmpi ne, %1, %c0_i32_0 : i32
    scf.if %2 {
      %cst_19 = arith.constant 0.000000e+00 : f32
      %35 = vector.broadcast %cst_19 : f32 to vector<16x96xf32>
      %c0_20 = arith.constant 0 : index
      %c0_21 = arith.constant 0 : index
      %36 = vector.load %arg9[%c0_20, %c0_21] : memref<16x96xf32, #tpu.memory_space<vmem>>, vector<16x96xf32>
      tpu.vector_store %arg9[%c0_20, %c0_21], %35 {strides = array<i32>} : memref<16x96xf32, #tpu.memory_space<vmem>>, vector<16x96xf32>,
    } else {
    }
    %c0 = arith.constant 0 : index
    %c0_1 = arith.constant 0 : index
    %3 = vector.load %arg3[%c0, %c0_1] : memref<16x32xf32, #tpu.memory_space<vmem>>, vector<16x32xf32>
    %cst = arith.constant dense<0.000000e+00> : vector<16xf32>
    %4 = vector.multi_reduction <add>, %3, %cst [1] : vector<16x32xf32> to vector<16xf32>
    %5 = vector.shape_cast %4 : vector<16xf32> to vector<16x1xf32>
    %cst_2 = arith.constant 3.200000e+01 : f32
    %6 = vector.broadcast %cst_2 : f32 to vector<16x1xf32>
    %7 = arith.divf %5, %6 : vector<16x1xf32>
    %8 = vector.broadcast %7 : vector<16x1xf32> to vector<16x32xf32>
    %9 = arith.subf %3, %8 : vector<16x32xf32>
    %10 = arith.mulf %9, %9 : vector<16x32xf32>
    %cst_3 = arith.constant dense<0.000000e+00> : vector<16xf32>
    %11 = vector.multi_reduction <add>, %10, %cst_3 [1] : vector<16x32xf32> to vector<16xf32>
    %12 = vector.shape_cast %11 : vector<16xf32> to vector<16x1xf32>
    %cst_4 = arith.constant 0.0322580636 : f32
    %13 = vector.broadcast %cst_4 : f32 to vector<16x1xf32>
    %14 = arith.mulf %12, %13 : vector<16x1xf32>
    %cst_5 = arith.constant 9.99999974E-6 : f32
    %15 = vector.broadcast %cst_5 : f32 to vector<16x1xf32>
    %16 = arith.addf %14, %15 : vector<16x1xf32>
    %17 = math.rsqrt %16 : vector<16x1xf32>
    %18 = vector.broadcast %17 : vector<16x1xf32> to vector<16x32xf32>
    %19 = arith.mulf %9, %18 : vector<16x32xf32>
    %c0_6 = arith.constant 0 : index
    %c0_7 = arith.constant 0 : index
    %20 = vector.load %arg4[%c0_6, %c0_7] : memref<1x32xf32, #tpu.memory_space<vmem>>, vector<1x32xf32>
    %21 = vector.broadcast %20 : vector<1x32xf32> to vector<16x32xf32>
    %22 = arith.mulf %19, %21 : vector<16x32xf32>
    %c0_8 = arith.constant 0 : index
    %c0_9 = arith.constant 0 : index
    %23 = vector.load %arg5[%c0_8, %c0_9] : memref<1x32xf32, #tpu.memory_space<vmem>>, vector<1x32xf32>
    %24 = vector.broadcast %23 : vector<1x32xf32> to vector<16x32xf32>
    %25 = arith.addf %22, %24 : vector<16x32xf32>
    %26 = arith.truncf %25 : vector<16x32xf32> to vector<16x32xbf16>
    %c0_10 = arith.constant 0 : index
    %c0_11 = arith.constant 0 : index
    %27 = vector.load %arg9[%c0_10, %c0_11] : memref<16x96xf32, #tpu.memory_space<vmem>>, vector<16x96xf32>
    %c0_12 = arith.constant 0 : index
    %c0_13 = arith.constant 0 : index
    %28 = vector.load %arg6[%c0_12, %c0_13] : memref<32x96xbf16, #tpu.memory_space<vmem>>, vector<32x96xbf16>
    %cst_14 = arith.constant dense<0.000000e+00> : vector<16x96xf32>
    %29 = tpu.matmul %26, %28, %cst_14 {dimension_numbers = #tpu.dot_dimension_numbers<[1], [0], [0], [1], [0, 0, 1, 1], [], []>} : vector<16x32xbf16>, vector<32x96xbf16>, vector<16x96xf32> -> vector<16x96xf32>
    %30 = arith.addf %27, %29 : vector<16x96xf32>
    %c0_15 = arith.constant 0 : index
    %c0_16 = arith.constant 0 : index
    %31 = vector.load %arg9[%c0_15, %c0_16] : memref<16x96xf32, #tpu.memory_space<vmem>>, vector<16x96xf32>
    tpu.vector_store %arg9[%c0_15, %c0_16], %30 {strides = array<i32>} : memref<16x96xf32, #tpu.memory_space<vmem>>, vector<16x96xf32>,
    %c0_i32_17 = arith.constant 0 : i32
    %32 = arith.cmpi eq, %arg2, %c0_i32_17 : i32
    %33 = arith.extui %32 : i1 to i32
    %c0_i32_18 = arith.constant 0 : i32
    %34 = arith.cmpi ne, %33, %c0_i32_18 : i32
    scf.if %34 {
      %c0_19 = arith.constant 0 : index
      %c0_20 = arith.constant 0 : index
      %35 = vector.load %arg9[%c0_19, %c0_20] : memref<16x96xf32, #tpu.memory_space<vmem>>, vector<16x96xf32>
      %c0_21 = arith.constant 0 : index
      %c0_22 = arith.constant 0 : index
      %36 = vector.load %arg7[%c0_21, %c0_22] : memref<1x96xf32, #tpu.memory_space<vmem>>, vector<1x96xf32>
      %37 = vector.broadcast %36 : vector<1x96xf32> to vector<16x96xf32>
      %38 = arith.addf %35, %37 : vector<16x96xf32>
      %c0_23 = arith.constant 0 : index
      %c0_24 = arith.constant 0 : index
      %39 = vector.load %arg8[%c0_23, %c0_24] : memref<16x96xf32, #tpu.memory_space<vmem>>, vector<16x96xf32>
      tpu.vector_store %arg8[%c0_23, %c0_24], %38 {strides = array<i32>} : memref<16x96xf32, #tpu.memory_space<vmem>>, vector<16x96xf32>,
    } else {
    }
    return
  }
  func.func @transform_0(%arg0: i32, %arg1: i32, %arg2: i32) -> (i32, i32) {
    %c0_i32 = arith.constant 0 : i32
    return %arg0, %arg2 : i32, i32
  }
  func.func @transform_1(%arg0: i32, %arg1: i32, %arg2: i32) -> (i32, i32) {
    %c0_i32 = arith.constant 0 : i32
    %c0_i32_0 = arith.constant 0 : i32
    %c0_i32_1 = arith.constant 0 : i32
    return %c0_i32, %c0_i32_0 : i32, i32
  }
  func.func @transform_2(%arg0: i32, %arg1: i32, %arg2: i32) -> (i32, i32) {
    %c0_i32 = arith.constant 0 : i32
    %c0_i32_0 = arith.constant 0 : i32
    %c0_i32_1 = arith.constant 0 : i32
    return %c0_i32, %c0_i32_0 : i32, i32
  }
  func.func @transform_3(%arg0: i32, %arg1: i32, %arg2: i32) -> (i32, i32) {
    %c0_i32 = arith.constant 0 : i32
    return %arg2, %arg1 : i32, i32
  }
  func.func @transform_4(%arg0: i32, %arg1: i32, %arg2: i32) -> (i32, i32) {
    %c0_i32 = arith.constant 0 : i32
    %c0_i32_0 = arith.constant 0 : i32
    return %c0_i32, %arg1 : i32, i32
  }
  func.func @transform_5(%arg0: i32, %arg1: i32, %arg2: i32) -> (i32, i32) {
    %c0_i32 = arith.constant 0 : i32
    return %arg0, %arg1 : i32, i32
  }
}

</mosaic_0001>

<bundles_post_ra>
// kernel: tpu_custom_call.1
= control target key start
LH: loop header
LB: loop body
LE: loop exit
PB: predicated region body
PF: predicated region fallthrough
CT: control target
= control target key end

     0   :  { %10 = vsyncpa [#allocation4], 0  ;;  %s412_s0 = inlined_call_operand.hbm [shape: f32[16,32], index: 0, kind: input, shape index: {}]   ;;  %s413_s1 = inlined_call_operand.vmem [shape: f32[1,32], index: 1, kind: input, shape index: {}]   ;;  %s414_s2 = inlined_call_operand.vmem [shape: f32[1,32], index: 2, kind: input, shape index: {}]   ;;  %s415_s3 = inlined_call_operand.hbm [shape: bf16[32,96], index: 3, kind: input, shape index: {}]   ;;  %s416_s4 = inlined_call_operand.vmem [shape: f32[1,96], index: 4, kind: input, shape index: {}]   ;;  %s417_s5 = inlined_call_operand.hbm [shape: f32[16,96], index: 5, kind: output, shape index: {}]  }
   0x1   :  { %11 = vsyncpa [#allocation7], 0 }
   0x2   :  { %12 = vsyncpa [#allocation5], 0  ;;  %s311_s18 = smov [#allocation3]   ;;  %s239_s22 = scalar_lea.hbm %s412_s0, 256 }
   0x3   :  { %s18_s19 = sshll.u32 %s311_s18, 4  ;;  %p240_p0 = scmp.ne.s32.totalorder %s412_s0, %s239_s22  ;;  %s19_s19 = int_to_ptr.vmem [resolvable:$true] %s18_s19 }
   0x4   :  { %p243_p1 = scmp.lt.u32.totalorder %s239_s22, %s412_s0 }
   0x6   :  { %p245_p2 = pnand %p243_p1, %p240_p0 }
   0x8   :  { %248 = shalt.err (!%p245_p2)
}
   0x9   :  { %s249_s27 = scalar_lea.vmem %s19_s19, 256  ;;  %p254_p4 = scmp.lt.s32.totalorder %s19_s19, %s19_s19 }
   0xa   :  { %p250_p3 = scmp.ne.s32.totalorder %s19_s19, %s249_s27  ;;  %p255_p5 = scmp.lt.s32.totalorder %s249_s27, %s249_s27 }
   0xc   :  { %p256_p6 = por %p255_p5, %p254_p4 }
   0xe   :  { %p257_p7 = pnand %p256_p6, %p250_p3 }
  0x10   :  { %260 = shalt.err (!%p257_p7)
}
  0x11   :  { %s312_s28 = smov 128   ;;  %s313_s29 = smov 8  }
  0x12   :  { %24 = dma.hbm_to_vmem [thread:$0]  %s412_s0, 256, %s19_s19, [#allocation4], %s312_s28, %s312_s28, %s313_s29  }
  0x13   :  { %s314_s7 = smov [#allocation6]   ;;  %s261_s11 = scalar_lea.hbm %s415_s3, 256 }
  0x14   :  { %s34_s8 = sshll.u32 %s314_s7, 4  ;;  %p262_p8 = scmp.ne.s32.totalorder %s415_s3, %s261_s11  ;;  %s35_s8 = int_to_ptr.vmem [resolvable:$true] %s34_s8 }
  0x15   :  { %p265_p9 = scmp.lt.u32.totalorder %s261_s11, %s415_s3 }
  0x17   :  { %p267_p10 = pnand %p265_p9, %p262_p8 }
  0x19   :  { %270 = shalt.err (!%p267_p10)
}
  0x1a   :  { %s271_s16 = scalar_lea.vmem %s35_s8, 256  ;;  %p276_p12 = scmp.lt.s32.totalorder %s35_s8, %s35_s8 }
  0x1b   :  { %p272_p11 = scmp.ne.s32.totalorder %s35_s8, %s271_s16  ;;  %p277_p13 = scmp.lt.s32.totalorder %s271_s16, %s271_s16 }
  0x1d   :  { %p278_p0 = por %p277_p13, %p276_p12 }
  0x1f   :  { %p279_p1 = pnand %p278_p0, %p272_p11 }
  0x21   :  { %282 = shalt.err (!%p279_p1)
}
  0x22   :  { %s315_s0 = smov 64   ;;  %s316_s17 = smov 4  }
  0x23   :  { %40 = dma.hbm_to_vmem [thread:$0]  %s415_s3, 256, %s35_s8, [#allocation7], %s315_s0, %s315_s0, %s316_s17  }
  0x24   :  { %305 = dma.done.wait [#allocation4], 256  }
  0x25   :  { %306 = vsyncadd [#allocation4], 4294967040 }
  0x26   :  { %307 = dma.done.wait [#allocation7], 256  }
  0x27   :  { %308 = vsyncadd [#allocation7], 4294967040  ;;  %vm59_vm0 = vcmask 261120   ;;  %v57_v0 = vld [vmem:[#allocation3] sm:$0xff]  ;;  %v58_v1 = vld [vmem:[#allocation3 + $0x8] sm:$0xff]  ;;  %vm54_vm1 = vcmask 785408  }
  0x28   :  { %v60_v2 = vsel %vm59_vm0, %v57_v0, 0.0  ;;  %v63_v3 = vsel %vm59_vm0, %v58_v1, 0.0  ;;  %v233_v14 = vld [vmem:[#allocation6] sm:$0xff]   ;;  %v317_v15 = vmov 0.0   ;;  %v234_v16 = vld [vmem:[#allocation6 + $0x8] sm:$0xff]   ;;  %vm318_vm2 = vmmov 0  }
  0x29   :  { %61 = vadd.xlane.f32.xlu0 %v60_v2  ;;  %216 = vmatprep.subr.bf16.mxu0 %v317_v15  ;;  %55 = vst.msk [vmem:[#allocation2] sm:$0xff] %vm54_vm1, %v317_v15  ;;  %56 = vst.msk [vmem:[#allocation2 + $0x8] sm:$0xff] %vm54_vm1, %v317_v15  ;;  %v207_v25 = vld [vmem:[%s413_s1] ss:$0 sm:$0xff]  ;;  %s319_s23 = smov [#allocation8]  }
  0x2a   :  { %217 = vmatpush3.bf16.msra.mxu0 %v233_v14  ;;  %220 = vmatprep.mubr.msk.bf16.mxu0 %vm318_vm2, %v317_v15  ;;  %v208_v29 = vld [vmem:[%s414_s2] ss:$0 sm:$0xff]  ;;  %s194_s24 = sshll.u32 %s319_s23, 4  ;;  %s195_s24 = int_to_ptr.vmem [resolvable:$true] %s194_s24 }
  0x2b   :  { %218 = vmatprep.subr.bf16.mxu0 %v317_v15  ;;  %v212_v42 = vld [vmem:[%s416_s4] ss:$0 sm:$0xff]  ;;  %s283_s25 = scalar_lea.vmem %s195_s24, 256  ;;  %p288_p3 = scmp.lt.s32.totalorder %s195_s24, %s195_s24 }
  0x2c   :  { %p284_p2 = scmp.ne.s32.totalorder %s195_s24, %s283_s25  ;;  %p289_p4 = scmp.lt.s32.totalorder %s283_s25, %s283_s25 }
  0x2d   :  { %64 = vadd.xlane.f32.xlu0 %v63_v3 }
  0x2e   :  { %219 = vmatpush3.bf16.msra.mxu0 %v234_v16  ;;  %p290_p5 = por %p289_p4, %p288_p3 }
  0x30   :  { %v106_v34 = vld [vmem:[#allocation2] sm:$0xff]  ;;  %v107_v36 = vld [vmem:[#allocation2 + $0x8] sm:$0xff]  ;;  %p291_p6 = pnand %p290_p5, %p284_p2 }
  0xb6   :  { %v62_v4 = vpop.xlane.xlu0 %61 }
  0xb7   :  { %v67_v5 = vmul.f32 0.03125, %v62_v4 }
  0xb9   :  { %v69_v6 = vsub.f32 %v57_v0, %v67_v5 }
  0xba   :  { %v65_v7 = vpop.xlane.xlu0 %64 }
  0xbb   :  { %v68_v8 = vmul.f32 0.03125, %v65_v7  ;;  %v71_v9 = vmul.f32 %v69_v6, %v69_v6 }
  0xbd   :  { %v70_v10 = vsub.f32 %v58_v1, %v68_v8  ;;  %v73_v11 = vsel %vm59_vm0, %v71_v9, 0.0 }
  0xbe   :  { %74 = vadd.xlane.f32.xlu1 %v73_v11 }
  0xbf   :  { %v72_v12 = vmul.f32 %v70_v10, %v70_v10 }
  0xc1   :  { %v76_v13 = vsel %vm59_vm0, %v72_v12, 0.0 }
  0xc2   :  { %77 = vadd.xlane.f32.xlu1 %v76_v13 }
 0x14b   :  { %v75_v17 = vpop.xlane.xlu1 %74 }
 0x14c   :  { %v79_v18 = vmul.f32 0.032258064, %v75_v17 }
 0x14e   :  { %v81_v19 = vadd.f32 1e-05, %v79_v18 }
 0x14f   :  { %v78_v20 = vpop.xlane.xlu1 %77 }
 0x150   :  { %235 = vrsqrt.f32 %v81_v19  ;;  %v80_v21 = vmul.f32 0.032258064, %v78_v20 }
 0x152   :  { %v82_v22 = vadd.f32 1e-05, %v80_v21 }
 0x154   :  { %237 = vrsqrt.f32 %v82_v22 }
 0x15a   :  { %v236_v23 = vpop.eup %235 }
 0x15b   :  { %v85_v24 = vmul.f32 %v236_v23, %v69_v6 }
 0x15d   :  { %v94_v28 = vmul.f32 %v207_v25, %v85_v24 }
 0x15e   :  { %v238_v26 = vpop.eup %237 }
 0x15f   :  { %v86_v27 = vmul.f32 %v238_v26, %v70_v10  ;;  %v103_v31 = vadd.f32 %v208_v29, %v94_v28 }
 0x161   :  { %v95_v30 = vmul.f32 %v207_v25, %v86_v27 }
 0x163   :  { %v104_v32 = vadd.f32 %v208_v29, %v95_v30 }
 0x165   :  { %v105_v33 = vpack.c.bf16 %v104_v32, %v103_v31 }
 0x167   :  { %221 = vmatmul.mubr.msk.bf16.vlgmr.msra.gmra.mrb[0].mxu0 %vm59_vm0, %v105_v33 }
 0x23a   :  { %v161_v35 = vpop.f32.mrb[0].mxu0 }
 0x23b   :  { %v168_v37 = vadd.f32 %v161_v35, %v106_v34  ;;  %v222_v38 = vpop.f32.mrb[1].mxu0 }
 0x23c   :  { %v164_v39 = vpop.f32.mrb[2].mxu0 }
 0x23d   :  { %171 = vst.msk [vmem:[#allocation2] sm:$0xff] %vm54_vm1, %v168_v37  ;;  %v169_v40 = vadd.f32 %v164_v39, %v107_v36  ;;  %v223_v41 = vpop.f32.mrb[3].mxu0 }
 0x23f   :  { %172 = vst.msk [vmem:[#allocation2 + $0x8] sm:$0xff] %vm54_vm1, %v169_v40 }
 0x244   :  { %v176_v43 = vld [vmem:[#allocation2] sm:$0xff] }
 0x245   :  { %v185_v44 = vadd.f32 %v212_v42, %v176_v43 }
 0x246   :  { %v177_v45 = vld [vmem:[#allocation2 + $0x8] sm:$0xff] }
 0x247   :  { %v186_v46 = vadd.f32 %v212_v42, %v177_v45  ;;  %187 = vst.msk [vmem:[#allocation8] sm:$0xff] %vm54_vm1, %v185_v44 }
 0x249   :  { %188 = vst.msk [vmem:[#allocation8 + $0x8] sm:$0xff] %vm54_vm1, %v186_v46 }
 0x24a   :  { %294 = shalt.err (!%p291_p6)
}
 0x24b   :  { %s295_s27 = scalar_lea.hbm %s417_s5, 256 }
 0x24c   :  { %p296_p7 = scmp.ne.s32.totalorder %s417_s5, %s295_s27  ;;  %p299_p8 = scmp.lt.u32.totalorder %s295_s27, %s417_s5 }
 0x24e   :  { %p301_p9 = pnand %p299_p8, %p296_p7 }
 0x250   :  { %304 = shalt.err (!%p301_p9)
}
 0x251   :  { %200 = dma.vmem_to_hbm [thread:$0]  %s195_s24, 256, %s417_s5, [#allocation5], %s312_s28, %s312_s28, %s313_s29  }
 0x252   :  { %309 = dma.done.wait [#allocation5], 256  }
 0x253   :  { %310 = vsyncadd [#allocation5], 4294967040 }
 0x254   :  { %204 = vsyncpa [#allocation4], 1 }
 0x255   :  { %205 = vsyncpa [#allocation7], 1 }
 0x256   :  { %206 = vsyncpa [#allocation5], 1 }

</bundles_post_ra>
